<compile_context>
chip_gen: v5e
topology: v5e:2x2
jax: 0.10.0
libtpu: 0.0.40
codegen_flags: <defaults>
</compile_context>

<pallas_src>
import jax
import jax.numpy as jnp
from jax.experimental import pallas as pl
from jax.experimental.pallas import tpu as pltpu


def _round_up(x: int, m: int) -> int:
    return ((x + m - 1) // m) * m


def _vmem_budget_bytes() -> int:
    """Usable scoped-VMEM budget: ~80% of per-core capacity, capped for safety."""
    try:
        cap = int(pltpu.get_tpu_info().vmem_capacity_bytes)
    except Exception:
        cap = 64 << 20  # conservative fallback (v7x per-TensorCore VMEM)
    # 80% leaves headroom for compiler-internal scratch / semaphores;
    # 100 MiB cap lets 128 MiB parts (v5e/v6e) use big tiles without over-asking.
    return min(int(0.80 * cap), 100 << 20)


def _prep(a, shape, dtype):
    """Cast (narrow first -> cheaper pad write) and zero-pad only when needed."""
    if a.dtype != dtype:
        a = a.astype(dtype)
    if tuple(a.shape) != tuple(shape):
        a = jnp.zeros(shape, dtype).at[tuple(slice(0, s) for s in a.shape)].set(a)
    return a


# ----------------------------- kernels --------------------------------------

def _mlp_kernel_resident(x_ref, w1_ref, b1_ref, w2_ref, b2_ref, o_ref):
    """Weights fully resident in VMEM: 1-D grid over batch tiles."""
    h = jnp.dot(x_ref[...], w1_ref[...], preferred_element_type=jnp.float32)
    h = jnp.maximum(h + b1_ref[...], 0.0)  # bias (broadcast over batch) + ReLU
    # Eval-mode dropout == identity.
    o = jnp.dot(h.astype(w2_ref.dtype), w2_ref[...],
                preferred_element_type=jnp.float32) + b2_ref[...]
    o_ref[...] = o.astype(o_ref.dtype)


def _mlp_kernel_reduce(x_ref, w1_ref, b1_ref, w2_ref, b2_ref, o_ref, acc_ref):
    """Hidden dim streamed (2-D grid, reduction axis last), f32 VMEM accumulator."""
    j = pl.program_id(1)

    @pl.when(j == 0)
    def _():
        # Seed the accumulator with the broadcast output bias -> no epilogue add.
        acc_ref[...] = jnp.broadcast_to(b2_ref[...].astype(jnp.float32),
                                        acc_ref.shape)

    # Layer 1 slab: (bt, in_p) @ (in_p, ht) -> (bt, ht), f32 accumulation on MXU.
    h = jnp.dot(x_ref[...], w1_ref[...], preferred_element_type=jnp.float32)
    h = jnp.maximum(h + b1_ref[...], 0.0)  # bias + ReLU
    # Eval-mode dropout == identity.

    # Layer 2 partial product: consume the h slab immediately into the accumulator.
    acc_ref[...] += jnp.dot(h.astype(w2_ref.dtype), w2_ref[...],
                            preferred_element_type=jnp.float32)

    @pl.when(j == pl.num_programs(1) - 1)
    def _():
        o_ref[...] = acc_ref[...].astype(o_ref.dtype)


# ----------------------------- wrapper ---------------------------------------

def mlp_forward(x, w1, b1, w2, b2, *, batch_tile=256, hidden_tile=512,
                mxu_dtype=jnp.bfloat16):
    """x: (B, in_dim); w1: (in_dim, H); b1: (H,)/(1,H); w2: (H, out_dim); b2: (out_dim,)/(1,out_dim)."""
    B, in_dim = x.shape
    H = w1.shape[1]
    out_dim = w2.shape[1]
    out_dtype = x.dtype

    compute_dtype = jnp.dtype(mxu_dtype) if mxu_dtype is not None else jnp.dtype(x.dtype)
    cs = compute_dtype.itemsize
    os_ = jnp.dtype(out_dtype).itemsize
    # sublane packing granularity of the compute dtype (f32:8, bf16:16, int8/fp8:32)
    sub = {4: 8, 2: 16, 1: 32}.get(cs, 8)

    # hardware-friendly padded dims (lanes=128)
    in_p = _round_up(in_dim, 128)
    h_p0 = _round_up(H, 128)
    out_p = _round_up(out_dim, 128)

    budget = _vmem_budget_bytes()
    B_sub = _round_up(B, sub)

    b1_2d = jnp.reshape(b1, (1, H))
    b2_2d = jnp.reshape(b2, (1, out_dim))

    # ---- VMEM footprint models (inputs/outputs assumed double-buffered) -----
    def resident_bytes(bt_):
        w_bytes = 2 * cs * (in_p * h_p0 + h_p0 + h_p0 * out_p + out_p)
        return (2 * bt_ * in_p * cs + 2 * bt_ * out_p * os_
                + bt_ * h_p0 * 4 + bt_ * out_p * 4 + w_bytes)

    def reduce_bytes(bt_, ht_):
        return (2 * bt_ * in_p * cs
                + 2 * cs * (in_p * ht_ + ht_ + ht_ * out_p + out_p)
                + 2 * bt_ * out_p * os_
                + bt_ * out_p * 4 + bt_ * ht_ * 4)

    # ---- path selection: keep full weights resident in VMEM if they fit -----
    bt = min(_round_up(batch_tile, sub), B_sub)
    bt_floor = min(B_sub, max(sub, 64))
    resident = False
    bt_r = bt
    while True:
        if resident_bytes(bt_r) <= budget:
            resident = True
            break
        if bt_r <= bt_floor:
            break
        bt_r = max(bt_floor, _round_up(bt_r // 2, sub))

    if resident:
        # ---------------- RESIDENT path (1-D batch grid) ---------------------
        bt = bt_r
        # Give the "parallel" batch axis >= 2 tiles (v7x has 2 TensorCores); this
        # is free here because the resident weights are not re-streamed per tile.
        if B_sub >= 2 * sub and _round_up(B, bt) // bt < 2:
            bt = _round_up((B_sub + 1) // 2, sub)
        B_p = _round_up(B, bt)
        h_p = h_p0

        xp = _prep(x, (B_p, in_p), compute_dtype)
        w1p = _prep(w1, (in_p, h_p), compute_dtype)
        b1p = _prep(b1_2d, (1, h_p), jnp.float32)
        w2p = _prep(w2, (h_p, out_p), compute_dtype)
        b2p = _prep(b2_2d, (1, out_p), jnp.float32)

        grid = (B_p // bt,)
        flops = 2 * B_p * (in_p * h_p + h_p * out_p)
        bytes_accessed = (B_p * in_p * cs
                          + cs * (in_p * h_p + h_p * out_p)
                          + 4 * (h_p + out_p)
                          + B_p * out_p * os_)

        out_padded = pl.pallas_call(
            _mlp_kernel_resident,
            out_shape=jax.ShapeDtypeStruct((B_p, out_p), out_dtype),
            grid_spec=pltpu.PrefetchScalarGridSpec(
                num_scalar_prefetch=0,
                grid=grid,
                in_specs=[
                    pl.BlockSpec((bt, in_p), lambda i: (i, 0)),    # x: batch tile
                    pl.BlockSpec((in_p, h_p), lambda i: (0, 0)),   # w1: resident
                    pl.BlockSpec((1, h_p), lambda i: (0, 0)),      # b1: resident
                    pl.BlockSpec((h_p, out_p), lambda i: (0, 0)),  # w2: resident
                    pl.BlockSpec((1, out_p), lambda i: (0, 0)),    # b2: resident
                ],
                out_specs=pl.BlockSpec((bt, out_p), lambda i: (i, 0)),
            ),
            compiler_params=pltpu.CompilerParams(
                dimension_semantics=("parallel",),
                vmem_limit_bytes=int(budget),
            ),
            cost_estimate=pl.CostEstimate(flops=flops, transcendentals=0,
                                          bytes_accessed=bytes_accessed),
        )(xp, w1p, b1p, w2p, b2p)
    else:
        # ---------------- REDUCE path (2-D grid, hidden streamed) ------------
        # Prefer the LARGEST batch tile that fits -> fewest full-weight re-streams.
        bt0 = min(_round_up(max(batch_tile, 256), sub), B_sub)
        ht0 = min(_round_up(hidden_tile, 128), h_p0)

        best = None
        bt_c = bt0
        while best is None and bt_c >= sub:
            ht_c = ht0
            while ht_c >= 128:
                if reduce_bytes(bt_c, ht_c) <= budget:
                    best = (bt_c, ht_c)
                    break
                if ht_c == 128:
                    break
                ht_c = max(128, _round_up(ht_c // 2, 128))
            if best is not None or bt_c == sub:
                break
            bt_c = max(sub, _round_up(bt_c // 2, sub))
        bt, ht = best if best is not None else (sub, 128)  # best effort

        B_p = _round_up(B, bt)
        h_p = _round_up(h_p0, ht)

        xp = _prep(x, (B_p, in_p), compute_dtype)
        w1p = _prep(w1, (in_p, h_p), compute_dtype)
        b1p = _prep(b1_2d, (1, h_p), jnp.float32)
        w2p = _prep(w2, (h_p, out_p), compute_dtype)
        b2p = _prep(b2_2d, (1, out_p), jnp.float32)

        grid = (B_p // bt, h_p // ht)  # reduction (hidden) axis last
        n_btiles = B_p // bt
        flops = 2 * B_p * (in_p * h_p + h_p * out_p)
        bytes_accessed = (B_p * in_p * cs
                          + n_btiles * cs * (in_p * h_p + h_p * out_p)
                          + 4 * (h_p + out_p)
                          + B_p * out_p * os_)

        out_padded = pl.pallas_call(
            _mlp_kernel_reduce,
            out_shape=jax.ShapeDtypeStruct((B_p, out_p), out_dtype),
            grid_spec=pltpu.PrefetchScalarGridSpec(
                num_scalar_prefetch=0,
                grid=grid,
                in_specs=[
                    pl.BlockSpec((bt, in_p), lambda i, j: (i, 0)),   # x: batch tile
                    pl.BlockSpec((in_p, ht), lambda i, j: (0, j)),   # w1: hidden slab
                    pl.BlockSpec((1, ht), lambda i, j: (0, j)),      # b1: hidden slab
                    pl.BlockSpec((ht, out_p), lambda i, j: (j, 0)),  # w2: hidden slab
                    pl.BlockSpec((1, out_p), lambda i, j: (0, 0)),   # b2: resident
                ],
                out_specs=pl.BlockSpec((bt, out_p), lambda i, j: (i, 0)),  # resident over j
                scratch_shapes=[pltpu.VMEM((bt, out_p), jnp.float32)],
            ),
            compiler_params=pltpu.CompilerParams(
                dimension_semantics=("parallel", "arbitrary"),
                vmem_limit_bytes=int(budget),
            ),
            cost_estimate=pl.CostEstimate(flops=flops, transcendentals=0,
                                          bytes_accessed=bytes_accessed),
        )(xp, w1p, b1p, w2p, b2p)

    if (B_p, out_p) == (B, out_dim):
        return out_padded
    return out_padded[:B, :out_dim]


if __name__ == "__main__":
    # Small shapes implied by the module: MLP over (batch, in_dim) features.
    batch, in_dim, hidden_dim, out_dim = 8, 16, 32, 8

    key = jax.random.PRNGKey(0)
    kx, k1, kb1, k2, kb2 = jax.random.split(key, 5)

    x = jax.random.normal(kx, (batch, in_dim), dtype=jnp.float32)

    # Deterministic kaiming-style normal init (std = sqrt(2/(1+a^2))/sqrt(fan_in), a=sqrt(2))
    std1 = (2.0 / 3.0) ** 0.5 / (in_dim ** 0.5)
    std2 = (2.0 / 3.0) ** 0.5 / (hidden_dim ** 0.5)
    w1 = std1 * jax.random.normal(k1, (in_dim, hidden_dim), dtype=jnp.float32)
    b1 = 0.01 * jax.random.normal(kb1, (1, hidden_dim), dtype=jnp.float32)
    w2 = std2 * jax.random.normal(k2, (hidden_dim, out_dim), dtype=jnp.float32)
    b2 = 0.01 * jax.random.normal(kb2, (1, out_dim), dtype=jnp.float32)

    out = mlp_forward(x, w1, b1, w2, b2)  # default: bf16 MXU inputs, f32 accumulation
    out = jax.block_until_ready(out)

    # Reference with matching precision: bf16 operands, f32 accumulation, f32 biases.
    xb = x.astype(jnp.bfloat16)
    w1b = w1.astype(jnp.bfloat16)
    w2b = w2.astype(jnp.bfloat16)
    h_ref = jnp.maximum(jnp.dot(xb, w1b, preferred_element_type=jnp.float32) + b1, 0.0)
    ref = jnp.dot(h_ref.astype(jnp.bfloat16), w2b, preferred_element_type=jnp.float32) + b2

    assert out.shape == (batch, out_dim)
    assert jnp.allclose(out, ref, atol=1e-2, rtol=1e-2), float(jnp.max(jnp.abs(out - ref)))

    print("KERNEL_OK")
</pallas_src>

<mosaic_0001>
module attributes {stable_mosaic.version = 11 : i64} {
  func.func @_mlp_kernel_resident(%arg0: i32, %arg1: memref<16x128xbf16, #tpu.memory_space<vmem>>, %arg2: memref<128x128xbf16, #tpu.memory_space<vmem>>, %arg3: memref<1x128xf32, #tpu.memory_space<vmem>>, %arg4: memref<128x128xbf16, #tpu.memory_space<vmem>>, %arg5: memref<1x128xf32, #tpu.memory_space<vmem>>, %arg6: memref<16x128xf32, #tpu.memory_space<vmem>>) attributes {dimension_semantics = [#tpu.dimension_semantics<parallel>], iteration_bounds = array<i64: 1>, scalar_prefetch = 0 : i64, scratch_operands = 0 : i64, tpu.core_type = #tpu.core_type<tc>, window_params = [{transform_indices = @transform_0, window_bounds = array<i64: 16, 128>}, {pipeline_mode = #tpu.pipeline_mode<synchronous>, transform_indices = @transform_1, window_bounds = array<i64: 128, 128>}, {pipeline_mode = #tpu.pipeline_mode<synchronous>, transform_indices = @transform_2, window_bounds = array<i64: 1, 128>}, {pipeline_mode = #tpu.pipeline_mode<synchronous>, transform_indices = @transform_3, window_bounds = array<i64: 128, 128>}, {pipeline_mode = #tpu.pipeline_mode<synchronous>, transform_indices = @transform_4, window_bounds = array<i64: 1, 128>}, {transform_indices = @transform_5, window_bounds = array<i64: 16, 128>}]} {
    %c0 = arith.constant 0 : index
    %c0_0 = arith.constant 0 : index
    %0 = vector.load %arg1[%c0, %c0_0] : memref<16x128xbf16, #tpu.memory_space<vmem>>, vector<16x128xbf16>
    %c0_1 = arith.constant 0 : index
    %c0_2 = arith.constant 0 : index
    %1 = vector.load %arg2[%c0_1, %c0_2] : memref<128x128xbf16, #tpu.memory_space<vmem>>, vector<128x128xbf16>
    %cst = arith.constant dense<0.000000e+00> : vector<16x128xf32>
    %2 = tpu.matmul %0, %1, %cst {dimension_numbers = #tpu.dot_dimension_numbers<[1], [0], [0], [1], [0, 0, 1, 1], [], []>} : vector<16x128xbf16>, vector<128x128xbf16>, vector<16x128xf32> -> vector<16x128xf32>
    %c0_3 = arith.constant 0 : index
    %c0_4 = arith.constant 0 : index
    %3 = vector.load %arg3[%c0_3, %c0_4] : memref<1x128xf32, #tpu.memory_space<vmem>>, vector<1x128xf32>
    %4 = vector.broadcast %3 : vector<1x128xf32> to vector<16x128xf32>
    %5 = arith.addf %2, %4 : vector<16x128xf32>
    %cst_5 = arith.constant 0.000000e+00 : f32
    %6 = vector.broadcast %cst_5 : f32 to vector<16x128xf32>
    %7 = arith.maximumf %5, %6 : vector<16x128xf32>
    %8 = arith.truncf %7 : vector<16x128xf32> to vector<16x128xbf16>
    %c0_6 = arith.constant 0 : index
    %c0_7 = arith.constant 0 : index
    %9 = vector.load %arg4[%c0_6, %c0_7] : memref<128x128xbf16, #tpu.memory_space<vmem>>, vector<128x128xbf16>
    %cst_8 = arith.constant dense<0.000000e+00> : vector<16x128xf32>
    %10 = tpu.matmul %8, %9, %cst_8 {dimension_numbers = #tpu.dot_dimension_numbers<[1], [0], [0], [1], [0, 0, 1, 1], [], []>} : vector<16x128xbf16>, vector<128x128xbf16>, vector<16x128xf32> -> vector<16x128xf32>
    %c0_9 = arith.constant 0 : index
    %c0_10 = arith.constant 0 : index
    %11 = vector.load %arg5[%c0_9, %c0_10] : memref<1x128xf32, #tpu.memory_space<vmem>>, vector<1x128xf32>
    %12 = vector.broadcast %11 : vector<1x128xf32> to vector<16x128xf32>
    %13 = arith.addf %10, %12 : vector<16x128xf32>
    %c0_11 = arith.constant 0 : index
    %c0_12 = arith.constant 0 : index
    %14 = vector.load %arg6[%c0_11, %c0_12] : memref<16x128xf32, #tpu.memory_space<vmem>>, vector<16x128xf32>
    tpu.vector_store %arg6[%c0_11, %c0_12], %13 {strides = array<i32>} : memref<16x128xf32, #tpu.memory_space<vmem>>, vector<16x128xf32>,
    return
  }
  func.func @transform_0(%arg0: i32) -> (i32, i32) {
    %c0_i32 = arith.constant 0 : i32
    %c0_i32_0 = arith.constant 0 : i32
    return %arg0, %c0_i32 : i32, i32
  }
  func.func @transform_1(%arg0: i32) -> (i32, i32) {
    %c0_i32 = arith.constant 0 : i32
    %c0_i32_0 = arith.constant 0 : i32
    %c0_i32_1 = arith.constant 0 : i32
    return %c0_i32, %c0_i32_0 : i32, i32
  }
  func.func @transform_2(%arg0: i32) -> (i32, i32) {
    %c0_i32 = arith.constant 0 : i32
    %c0_i32_0 = arith.constant 0 : i32
    %c0_i32_1 = arith.constant 0 : i32
    return %c0_i32, %c0_i32_0 : i32, i32
  }
  func.func @transform_3(%arg0: i32) -> (i32, i32) {
    %c0_i32 = arith.constant 0 : i32
    %c0_i32_0 = arith.constant 0 : i32
    %c0_i32_1 = arith.constant 0 : i32
    return %c0_i32, %c0_i32_0 : i32, i32
  }
  func.func @transform_4(%arg0: i32) -> (i32, i32) {
    %c0_i32 = arith.constant 0 : i32
    %c0_i32_0 = arith.constant 0 : i32
    %c0_i32_1 = arith.constant 0 : i32
    return %c0_i32, %c0_i32_0 : i32, i32
  }
  func.func @transform_5(%arg0: i32) -> (i32, i32) {
    %c0_i32 = arith.constant 0 : i32
    %c0_i32_0 = arith.constant 0 : i32
    return %arg0, %c0_i32 : i32, i32
  }
}

</mosaic_0001>

<bundles_post_ra>
// kernel: tpu_custom_call.1
= control target key start
LH: loop header
LB: loop body
LE: loop exit
PB: predicated region body
PF: predicated region fallthrough
CT: control target
= control target key end

     0   :  { %10 = vsyncpa [#allocation3], 0  ;;  %s518_s0 = inlined_call_operand.hbm [shape: bf16[16,128], index: 0, kind: input, shape index: {}]   ;;  %s519_s1 = inlined_call_operand.hbm [shape: bf16[128,128], index: 1, kind: input, shape index: {}]   ;;  %s520_s2 = inlined_call_operand.vmem [shape: f32[1,128], index: 2, kind: input, shape index: {}]   ;;  %s521_s3 = inlined_call_operand.hbm [shape: bf16[128,128], index: 3, kind: input, shape index: {}]   ;;  %s522_s4 = inlined_call_operand.vmem [shape: f32[1,128], index: 4, kind: input, shape index: {}]   ;;  %s523_s5 = inlined_call_operand.hbm [shape: f32[16,128], index: 5, kind: output, shape index: {}]  }
   0x1   :  { %11 = vsyncpa [#allocation6], 0 }
   0x2   :  { %12 = vsyncpa [#allocation4], 0  ;;  %s30_s20 = sshll.u32 %s519_s1, 4  ;;  %s462_s21 = smov [#allocation5]   ;;  %s31_s20 = int_to_ptr.hbm [resolvable:$true] %s30_s20 }
   0x3   :  { %s32_s22 = sshll.u32 %s462_s21, 4  ;;  %s17_s25 = sshll.u32 %s518_s0, 4  ;;  %s33_s22 = int_to_ptr.vmem [resolvable:$true] %s32_s22  ;;  %s18_s25 = int_to_ptr.hbm [resolvable:$true] %s17_s25 }
   0x4   :  { %s463_s26 = smov 64   ;;  %s464_s27 = smov 4  }
   0x5   :  { %38 = dma.hbm_to_vmem [thread:$0]  %s31_s20, 1024, %s33_s22, [#allocation6], %s463_s26, %s463_s26, %s464_s27  }
   0x6   :  { %s465_s28 = smov [#allocation2]   ;;  %s45_s7 = sshll.u32 %s521_s3, 4  ;;  %s46_s7 = int_to_ptr.hbm [resolvable:$true] %s45_s7 }
   0x7   :  { %s19_s29 = sshll.u32 %s465_s28, 4  ;;  %s466_s1 = smov [#allocation7]   ;;  %s20_s29 = int_to_ptr.vmem [resolvable:$true] %s19_s29 }
   0x8   :  { %25 = dma.hbm_to_vmem [thread:$0]  %s18_s25, 128, %s20_s29, [#allocation3], %s463_s26, %s463_s26, %s464_s27  }
   0x9   :  { %s47_s8 = sshll.u32 %s466_s1, 4  ;;  %s48_s8 = int_to_ptr.vmem [resolvable:$true] %s47_s8 }
   0xa   :  { %53 = dma.hbm_to_vmem [thread:$0]  %s46_s7, 1024, %s48_s8, [#allocation6], %s463_s26, %s463_s26, %s464_s27  }
   0xb   :  { %456 = dma.done.wait [#allocation3], 128  }
   0xc   :  { %457 = vsyncadd [#allocation3], 4294967168 }
   0xd   :  { %458 = dma.done.wait [#allocation6], 2048  }
   0xe   :  { %459 = vsyncadd [#allocation6], 4294965248  ;;  %v341_v0 = vld [vmem:[#allocation5 + $0x38] sm:$0xff]  ;;  %v340_v1 = vld [vmem:[#allocation5 + $0x30] sm:$0xff]  ;;  %s467_s11 = smov [#allocation8]   ;;  %s468_s15 = smov 128  }
   0xf   :  { %144 = vmatpush.bf16.msra.mxu0 %v341_v0  ;;  %v349_v2 = vld [vmem:[#allocation7 + $0x38] sm:$0xff]  ;;  %v348_v3 = vld [vmem:[#allocation7 + $0x30] sm:$0xff]  ;;  %v339_v4 = vld [vmem:[#allocation5 + $0x28] sm:$0xff]  ;;  %s249_s12 = sshll.u32 %s467_s11, 4  ;;  %s469_s16 = smov 8   ;;  %s250_s12 = int_to_ptr.vmem [resolvable:$true] %s249_s12 }
  0x10   :  { %229 = vmatpush.bf16.msra.mxu1 %v349_v2  ;;  %v347_v5 = vld [vmem:[#allocation7 + $0x28] sm:$0xff]  ;;  %v338_v6 = vld [vmem:[#allocation5 + $0x20] sm:$0xff]  ;;  %v337_v8 = vld [vmem:[#allocation5 + $0x18] sm:$0xff] }
  0x11   :  { %v346_v7 = vld [vmem:[#allocation7 + $0x20] sm:$0xff]  ;;  %v336_v9 = vld [vmem:[#allocation5 + $0x10] sm:$0xff]  ;;  %v335_v10 = vld [vmem:[#allocation5 + $0x8] sm:$0xff] }
  0x12   :  { %v334_v11 = vld [vmem:[#allocation5] sm:$0xff]  ;;  %v333_v12 = vld [vmem:[#allocation2] sm:$0xff]  ;;  %v344_v14 = vld [vmem:[#allocation7 + $0x10] sm:$0xff] }
  0x13   :  { %145 = vmatpush.bf16.msra.mxu0 %v340_v1  ;;  %v345_v13 = vld [vmem:[#allocation7 + $0x18] sm:$0xff]  ;;  %v343_v15 = vld [vmem:[#allocation7 + $0x8] sm:$0xff]  ;;  %v342_v16 = vld [vmem:[#allocation7] sm:$0xff] }
  0x14   :  { %230 = vmatpush.bf16.msra.mxu1 %v348_v3  ;;  %v358_v18 = vld [vmem:[%s520_s2] ss:$0 sm:$0xff]  ;;  %s251_s2 = sshll.u32 %s523_s5, 4  ;;  %s252_s2 = int_to_ptr.hbm [resolvable:$true] %s251_s2 }
  0x15   :  { %v359_v25 = vld [vmem:[%s522_s4] ss:$0 sm:$0xff] }
  0x17   :  { %146 = vmatpush.bf16.msra.mxu0 %v339_v4 }
  0x18   :  { %231 = vmatpush.bf16.msra.mxu1 %v347_v5 }
  0x1b   :  { %147 = vmatpush.bf16.msra.mxu0 %v338_v6 }
  0x1c   :  { %232 = vmatpush.bf16.msra.mxu1 %v346_v7 }
  0x1f   :  { %148 = vmatpush.bf16.msra.mxu0 %v337_v8 }
  0x20   :  { %233 = vmatpush.bf16.msra.mxu1 %v345_v13 }
  0x23   :  { %149 = vmatpush.bf16.msra.mxu0 %v336_v9 }
  0x24   :  { %234 = vmatpush.bf16.msra.mxu1 %v344_v14 }
  0x27   :  { %150 = vmatpush.bf16.msra.mxu0 %v335_v10 }
  0x28   :  { %235 = vmatpush.bf16.msra.mxu1 %v343_v15 }
  0x2b   :  { %151 = vmatpush.bf16.msra.mxu0 %v334_v11 }
  0x2c   :  { %236 = vmatpush.bf16.msra.mxu1 %v342_v16 }
  0x2e   :  { %152 = vmatmul.bf16.vlgmr.msra.gmra.mxu0 %v333_v12 }
  0xab   :  { %v153_v17 = vpop.f32.mrf.mxu0 }
  0xac   :  { %v154_v19 = vadd.f32 %v358_v18, %v153_v17 }
  0xae   :  { %v158_v22 = vmax.f32 %v154_v19, 0.0 }
  0xb3   :  { %v155_v20 = vpop.f32.mrf.mxu0 }
  0xb4   :  { %v156_v21 = vadd.f32 %v358_v18, %v155_v20 }
  0xb6   :  { %v159_v23 = vmax.f32 %v156_v21, 0.0 }
  0xb8   :  { %v160_v24 = vpack.c.bf16 %v159_v23, %v158_v22 }
  0xba   :  { %237 = vmatmul.bf16.vlgmr.msra.gmra.mxu1 %v160_v24 }
 0x137   :  { %v238_v26 = vpop.f32.mrf.mxu1 }
 0x138   :  { %v239_v27 = vadd.f32 %v359_v25, %v238_v26 }
 0x13a   :  { %243 = vst [vmem:[#allocation8] sm:$0xff] %v239_v27 }
 0x13f   :  { %v240_v28 = vpop.f32.mrf.mxu1 }
 0x140   :  { %v241_v29 = vadd.f32 %v359_v25, %v240_v28 }
 0x142   :  { %244 = vst [vmem:[#allocation8 + $0x8] sm:$0xff] %v241_v29 }
 0x143   :  { %257 = dma.vmem_to_hbm [thread:$0]  %s250_s12, 256, %s252_s2, [#allocation4], %s468_s15, %s468_s15, %s469_s16  }
 0x144   :  { %460 = dma.done.wait [#allocation4], 256  }
 0x145   :  { %461 = vsyncadd [#allocation4], 4294967040 }
 0x146   :  { %262 = vsyncpa [#allocation3], 1 }
 0x147   :  { %263 = vsyncpa [#allocation6], 1 }
 0x148   :  { %264 = vsyncpa [#allocation4], 1 }

</bundles_post_ra>
